<compile_context>
chip_gen: v7x
topology: tpu7x:2x2x1
jax: 0.10.0
libtpu: 0.0.40
codegen_flags: <defaults>
</compile_context>

<pallas_src>
import functools

import jax
import jax.numpy as jnp
from jax import lax
from jax.experimental import pallas as pl
from jax.experimental.pallas import tpu as pltpu


# Sentinel in *squared*-distance space; sqrt(1e18) ~= 1e9, matching the
# reference's `+ is_pos * 1e9` sentinel in plain-distance space.
_BIG_SQ = 1e18


def _triplet_kernel(xa_ref, xkT_ref, sqa_ref, sqk_ref, tcol_ref, trow_ref,
                    out_ref, *, margin, hard_mining):
    # Gram tile on the MXU in the native dtype (keys pre-transposed in the
    # wrapper -> canonical A@B contraction), f32 accumulation.
    gram = lax.dot_general(xa_ref[...], xkT_ref[...],
                           (((1,), (0,)), ((), ())),
                           preferred_element_type=jnp.float32)       # (TM, N)

    # Clamped squared euclidean distance; row norms precomputed in the wrapper
    # (matches clamp(min=1e-12).sqrt() of the reference).
    dist2 = jnp.maximum(sqa_ref[...] + sqk_ref[...] - 2.0 * gram, 1e-12)

    # Exact int32 label compare.
    pos_b = tcol_ref[...] == trow_ref[...]                            # (TM, N) bool

    if hard_mining:
        # Mine on squared distances (sqrt is monotone) -> only 2*TM sqrts and
        # no is_pos f32 cast / multiply.
        d_ap2 = jnp.max(jnp.where(pos_b, dist2, 0.0), axis=1, keepdims=True)
        d_an2 = jnp.min(jnp.where(pos_b, _BIG_SQ, dist2), axis=1, keepdims=True)
        dist_ap = jnp.sqrt(d_ap2)
        dist_an = jnp.sqrt(d_an2)
    else:
        # Weighted (softmax) mining needs dense distances for the exp weights.
        dist = jnp.sqrt(dist2)                                        # (TM, N)
        is_pos = pos_b.astype(jnp.float32)
        is_neg = 1.0 - is_pos
        d_ap = dist * is_pos
        d_an = dist * is_neg
        # d_ap / d_an are already masked -> no re-masking inside the max.
        max_ap = jnp.max(d_ap, axis=1, keepdims=True)
        max_an = jnp.max(-d_an, axis=1, keepdims=True)
        # Single fused exponential (EUP has one VLIW slot); the masked-out
        # lanes are discarded by the is_pos / is_neg multiplies below.
        e = jnp.exp(jnp.where(pos_b, d_ap - max_ap, -d_an - max_an))
        e_ap = e * is_pos
        e_an = e * is_neg
        z_ap = jnp.sum(e_ap, axis=1, keepdims=True) + 1e-6
        z_an = jnp.sum(e_an, axis=1, keepdims=True) + 1e-6
        dist_ap = jnp.sum(d_ap * e_ap, axis=1, keepdims=True) * pl.reciprocal(
            z_ap, approx=True)
        dist_an = jnp.sum(d_an * e_an, axis=1, keepdims=True) * pl.reciprocal(
            z_an, approx=True)

    # Margin ranking loss with y = 1: relu(margin + d_ap - d_an).
    # TODO(synk): margin == 0 soft-margin path (with the Inf fallback) not
    #             lowered; the module default margin = 0.3 > 0 uses this path.
    per_anchor = jnp.maximum(margin + dist_ap - dist_an, 0.0)         # (TM, 1)
    partial = jnp.sum(per_anchor)

    # Lane-dense per-block partial-sum tile; the wrapper reads [i, 0, 0].
    out_ref[...] = jnp.full(out_ref.shape, partial, dtype=jnp.float32)


def _tpu_defaults():
    """(physical VMEM bytes, max row-block for the hard path)."""
    vmem_phys = 128 * 1024 * 1024
    max_tm_hard = 256
    try:
        info = pltpu.get_tpu_info()
        vmem_phys = int(getattr(info, "vmem_capacity_bytes", vmem_phys))
        name = (str(getattr(info, "chip_version", "")) +
                str(getattr(info, "name", "")))
        if "5" in name:   # v5e: 4x(128x128) MXU -> TM=128 already fills it.
            max_tm_hard = 128
    except Exception:
        pass
    return vmem_phys, max_tm_hard


def _pick_block_rows(n, max_tm):
    for tm in (256, 128, 64, 32, 16, 8):
        if tm <= max_tm and n % tm == 0:
            return tm
    return n   # single block covering all rows (block == full array dim)


def _vmem_limit(n, d, tm, itemsize, vmem_phys):
    """Derive vmem_limit_bytes from actual buffer sizes (not a magic 48MiB)."""
    resident = n * d * itemsize + n * 4 + n * 4       # keys^T + norms + labels (1-buffered)
    per_block = 2 * (tm * d * itemsize + 2 * tm * 4) + 2 * 8 * 128 * 4
    scratch = 8 * tm * n * 4                          # (TM, N) f32 temporaries headroom
    need = resident + per_block + scratch + (4 << 20)
    return int(min(max(need, 16 << 20), (vmem_phys * 3) // 4))


def _invariant_spec(shape, single_buffer):
    ndim = len(shape)
    index_map = lambda i, _nd=ndim: (0,) * _nd
    if single_buffer:
        return pl.BlockSpec(shape, index_map, pipeline_mode=pl.Buffered(1))
    return pl.BlockSpec(shape, index_map)


def triplet_loss(inputs, targets, *, margin=0.3, loss_weight=1.0,
                 norm_feat=False, hard_mining=True, block_rows=None):
    """Pallas TripletLoss forward. inputs: [N, D] float, targets: [N] int."""
    # TODO(synk): norm_feat=True (cosine_dist) path not implemented; default False.
    assert not norm_feat
    N, D = inputs.shape

    vmem_phys, max_tm_hard = _tpu_defaults()
    # Weighted path keeps many (TM, N) f32 temporaries live -> cap TM at 128.
    max_tm = max_tm_hard if hard_mining else min(max_tm_hard, 128)
    if block_rows is None:
        block_rows = _pick_block_rows(N, max_tm)
    assert N % block_rows == 0
    grid_rows = N // block_rows

    # Grid-invariant precompute hoisted out of the kernel (done once by XLA):
    x32 = inputs.astype(jnp.float32)
    sq = jnp.sum(x32 * x32, axis=1)                 # (N,) f32 row norms
    sq_col = sq.reshape(N, 1)                       # anchor norms (sliced per block)
    sq_row = sq.reshape(1, N)                       # key norms (resident row)
    xT = inputs.T                                   # (D, N) keys, canonical A@B form
    tcol = targets.astype(jnp.int32).reshape(N, 1)
    trow = targets.astype(jnp.int32).reshape(1, N)

    itemsize = jnp.dtype(inputs.dtype).itemsize
    vmem_limit = _vmem_limit(N, D, block_rows, itemsize, vmem_phys)
    cost = pl.CostEstimate(
        flops=2 * N * N * D,
        transcendentals=(2 * N if hard_mining else 2 * N * N),
        bytes_accessed=2 * N * D * itemsize + 4 * N * 4 + grid_rows * 8 * 128 * 4,
    )

    kernel = functools.partial(_triplet_kernel, margin=float(margin),
                               hard_mining=bool(hard_mining))

    def build(single_buffer):
        return pl.pallas_call(
            kernel,
            out_shape=jax.ShapeDtypeStruct((grid_rows, 8, 128), jnp.float32),
            grid_spec=pltpu.PrefetchScalarGridSpec(
                num_scalar_prefetch=0,
                grid=(grid_rows,),
                in_specs=[
                    pl.BlockSpec((block_rows, D), lambda i: (i, 0)),   # anchor rows
                    _invariant_spec((D, N), single_buffer),            # keys^T (resident)
                    pl.BlockSpec((block_rows, 1), lambda i: (i, 0)),   # anchor norms
                    _invariant_spec((1, N), single_buffer),            # key norms (row)
                    pl.BlockSpec((block_rows, 1), lambda i: (i, 0)),   # anchor labels
                    _invariant_spec((1, N), single_buffer),            # all labels (row)
                ],
                out_specs=pl.BlockSpec((1, 8, 128), lambda i: (i, 0, 0)),
            ),
            compiler_params=pltpu.CompilerParams(
                dimension_semantics=("parallel",),
                vmem_limit_bytes=vmem_limit,
            ),
            cost_estimate=cost,
        )

    args = (inputs, xT, sq_col, sq_row, tcol, trow)
    try:
        partials = build(True)(*args)
    except Exception:
        # TODO(synk): drop this fallback once pl.Buffered(1) (single-buffered
        # grid-invariant inputs) is confirmed on all Mosaic versions in use.
        partials = build(False)(*args)

    # Final tiny reduction / mean done in the wrapper.
    return jnp.sum(partials[:, 0, 0]) * (loss_weight / N)


# ---------------- plain-JAX reference (mirrors the PyTorch code) ----------------
def _reference_triplet_loss(inputs, targets, margin=0.3, loss_weight=1.0,
                            hard_mining=True):
    x = inputs.astype(jnp.float32)
    sq = jnp.sum(x * x, axis=1, keepdims=True)
    dist = jnp.sqrt(jnp.maximum(sq + sq.T - 2.0 * (x @ x.T), 1e-12))
    t = targets.reshape(-1, 1)
    is_pos = (t == t.T).astype(jnp.float32)
    is_neg = (t != t.T).astype(jnp.float32)
    if hard_mining:
        dist_ap = jnp.max(dist * is_pos, axis=1)
        dist_an = jnp.min(dist * is_neg + is_pos * 1e9, axis=1)
    else:
        d_ap, d_an = dist * is_pos, dist * is_neg
        def sw(d, m):
            mx = jnp.max(d * m, axis=1, keepdims=True)
            e = jnp.exp(d - mx) * m
            return e / (jnp.sum(e, axis=1, keepdims=True) + 1e-6)
        dist_ap = jnp.sum(d_ap * sw(d_ap, is_pos), axis=1)
        dist_an = jnp.sum(d_an * sw(-d_an, is_neg), axis=1)
    loss = jnp.mean(jnp.maximum(0.0, margin + dist_ap - dist_an))
    return loss_weight * loss


if __name__ == "__main__":
    key = jax.random.PRNGKey(0)
    k1, k2 = jax.random.split(key)

    # Case 1: single-block grid (N = 8, D = 128), hard mining.
    N, D = 8, 128
    x1 = jax.random.normal(k1, (N, D), dtype=jnp.float32)
    t1 = jnp.array([0, 0, 1, 1, 2, 2, 3, 3], dtype=jnp.int32)
    out1 = jax.block_until_ready(triplet_loss(x1, t1, hard_mining=True))
    ref1 = _reference_triplet_loss(x1, t1, hard_mining=True)
    assert jnp.allclose(out1, ref1, rtol=1e-4, atol=1e-4), (out1, ref1)

    # Weighted-mining path (approx reciprocal in-kernel -> slightly looser tol).
    out1w = jax.block_until_ready(triplet_loss(x1, t1, hard_mining=False))
    ref1w = _reference_triplet_loss(x1, t1, hard_mining=False)
    assert jnp.allclose(out1w, ref1w, rtol=2e-3, atol=2e-3), (out1w, ref1w)

    # Case 2: multi-block parallel grid (N = 16, block_rows = 8 -> grid of 2).
    N2, D2 = 16, 128
    x2 = jax.random.normal(k2, (N2, D2), dtype=jnp.float32)
    t2 = jnp.repeat(jnp.arange(4, dtype=jnp.int32), 4)
    out2 = jax.block_until_ready(
        triplet_loss(x2, t2, hard_mining=True, block_rows=8))
    ref2 = _reference_triplet_loss(x2, t2, hard_mining=True)
    assert jnp.allclose(out2, ref2, rtol=1e-4, atol=1e-4), (out2, ref2)

    # Case 3: bf16 features fed straight to the MXU (f32 accumulation).
    # NOTE: bf16 Gram + f32 norms can show cancellation for near-identical
    # pairs; covered by the looser tolerance here.
    x2_bf16 = x2.astype(jnp.bfloat16)
    out3 = jax.block_until_ready(
        triplet_loss(x2_bf16, t2, hard_mining=True, block_rows=8))
    ref3 = _reference_triplet_loss(x2_bf16.astype(jnp.float32), t2,
                                   hard_mining=True)
    assert jnp.allclose(out3, ref3, rtol=1e-2, atol=1e-2), (out3, ref3)

    print("KERNEL_OK")
</pallas_src>

<mosaic_0001>
module attributes {stable_mosaic.version = 11 : i64} {
  func.func @_triplet_kernel(%arg0: i32, %arg1: memref<8x128xf32, #tpu.memory_space<vmem>>, %arg2: memref<128x8xf32, #tpu.memory_space<vmem>>, %arg3: memref<8x1xf32, #tpu.memory_space<vmem>>, %arg4: memref<1x8xf32, #tpu.memory_space<vmem>>, %arg5: memref<8x1xi32, #tpu.memory_space<vmem>>, %arg6: memref<1x8xi32, #tpu.memory_space<vmem>>, %arg7: memref<1x8x128xf32, #tpu.memory_space<vmem>>) attributes {dimension_semantics = [#tpu.dimension_semantics<parallel>], iteration_bounds = array<i64: 1>, scalar_prefetch = 0 : i64, scratch_operands = 0 : i64, tpu.core_type = #tpu.core_type<tc>, window_params = [{transform_indices = @transform_0, window_bounds = array<i64: 8, 128>}, {pipeline_mode = #tpu.pipeline_mode<synchronous>, transform_indices = @transform_1, window_bounds = array<i64: 128, 8>}, {transform_indices = @transform_2, window_bounds = array<i64: 8, 1>}, {pipeline_mode = #tpu.pipeline_mode<synchronous>, transform_indices = @transform_3, window_bounds = array<i64: 1, 8>}, {transform_indices = @transform_4, window_bounds = array<i64: 8, 1>}, {pipeline_mode = #tpu.pipeline_mode<synchronous>, transform_indices = @transform_5, window_bounds = array<i64: 1, 8>}, {transform_indices = @transform_6, window_bounds = array<i64: 1, 8, 128>}]} {
    %c0 = arith.constant 0 : index
    %c0_0 = arith.constant 0 : index
    %0 = vector.load %arg1[%c0, %c0_0] : memref<8x128xf32, #tpu.memory_space<vmem>>, vector<8x128xf32>
    %c0_1 = arith.constant 0 : index
    %c0_2 = arith.constant 0 : index
    %1 = vector.load %arg2[%c0_1, %c0_2] : memref<128x8xf32, #tpu.memory_space<vmem>>, vector<128x8xf32>
    %cst = arith.constant dense<0.000000e+00> : vector<8x8xf32>
    %2 = tpu.matmul %0, %1, %cst {dimension_numbers = #tpu.dot_dimension_numbers<[1], [0], [0], [1], [0, 0, 1, 1], [], []>} : vector<8x128xf32>, vector<128x8xf32>, vector<8x8xf32> -> vector<8x8xf32>
    %c0_3 = arith.constant 0 : index
    %c0_4 = arith.constant 0 : index
    %3 = vector.load %arg3[%c0_3, %c0_4] : memref<8x1xf32, #tpu.memory_space<vmem>>, vector<8x1xf32>
    %c0_5 = arith.constant 0 : index
    %c0_6 = arith.constant 0 : index
    %4 = vector.load %arg4[%c0_5, %c0_6] : memref<1x8xf32, #tpu.memory_space<vmem>>, vector<1x8xf32>
    %5 = vector.broadcast %3 : vector<8x1xf32> to vector<8x8xf32>
    %6 = vector.broadcast %4 : vector<1x8xf32> to vector<8x8xf32>
    %7 = arith.addf %5, %6 : vector<8x8xf32>
    %cst_7 = arith.constant 2.000000e+00 : f32
    %8 = vector.broadcast %cst_7 : f32 to vector<8x8xf32>
    %9 = arith.mulf %8, %2 : vector<8x8xf32>
    %10 = arith.subf %7, %9 : vector<8x8xf32>
    %cst_8 = arith.constant 9.99999996E-13 : f32
    %11 = vector.broadcast %cst_8 : f32 to vector<8x8xf32>
    %12 = arith.maximumf %10, %11 : vector<8x8xf32>
    %c0_9 = arith.constant 0 : index
    %c0_10 = arith.constant 0 : index
    %13 = vector.load %arg5[%c0_9, %c0_10] : memref<8x1xi32, #tpu.memory_space<vmem>>, vector<8x1xi32>
    %c0_11 = arith.constant 0 : index
    %c0_12 = arith.constant 0 : index
    %14 = vector.load %arg6[%c0_11, %c0_12] : memref<1x8xi32, #tpu.memory_space<vmem>>, vector<1x8xi32>
    %15 = vector.broadcast %13 : vector<8x1xi32> to vector<8x8xi32>
    %16 = vector.broadcast %14 : vector<1x8xi32> to vector<8x8xi32>
    %17 = arith.cmpi eq, %15, %16 : vector<8x8xi32>
    %cst_13 = arith.constant 0.000000e+00 : f32
    %18 = vector.broadcast %cst_13 : f32 to vector<8x8xf32>
    %19 = arith.select %17, %12, %18 : vector<8x8xi1>, vector<8x8xf32>
    %cst_14 = arith.constant dense<0xFF800000> : vector<8xf32>
    %20 = vector.multi_reduction <maximumf>, %19, %cst_14 [1] : vector<8x8xf32> to vector<8xf32>
    %21 = vector.shape_cast %20 : vector<8xf32> to vector<8x1xf32>
    %cst_15 = arith.constant 9.99999984E+17 : f32
    %22 = vector.broadcast %cst_15 : f32 to vector<8x8xf32>
    %23 = arith.select %17, %22, %12 : vector<8x8xi1>, vector<8x8xf32>
    %cst_16 = arith.constant dense<0x7F800000> : vector<8xf32>
    %24 = vector.multi_reduction <minimumf>, %23, %cst_16 [1] : vector<8x8xf32> to vector<8xf32>
    %25 = vector.shape_cast %24 : vector<8xf32> to vector<8x1xf32>
    %26 = math.sqrt %21 : vector<8x1xf32>
    %27 = math.sqrt %25 : vector<8x1xf32>
    %cst_17 = arith.constant 3.000000e-01 : f32
    %28 = vector.broadcast %cst_17 : f32 to vector<8x1xf32>
    %29 = arith.addf %28, %26 : vector<8x1xf32>
    %30 = arith.subf %29, %27 : vector<8x1xf32>
    %cst_18 = arith.constant 0.000000e+00 : f32
    %31 = vector.broadcast %cst_18 : f32 to vector<8x1xf32>
    %32 = arith.maximumf %30, %31 : vector<8x1xf32>
    %33 = vector.shape_cast %32 : vector<8x1xf32> to vector<1x8x1xf32>
    %cst_19 = arith.constant dense<0.000000e+00> : vector<1xf32>
    %34 = vector.multi_reduction <add>, %33, %cst_19 [1, 2] : vector<1x8x1xf32> to vector<1xf32>
    %35 = vector.shape_cast %34 : vector<1xf32> to vector<1x1x1xf32>
    %36 = vector.extract %35[0, 0, 0] : f32 from vector<1x1x1xf32>
    %37 = vector.broadcast %36 : f32 to vector<1x8x128xf32>
    %c0_20 = arith.constant 0 : index
    %c0_21 = arith.constant 0 : index
    %c0_22 = arith.constant 0 : index
    %38 = vector.load %arg7[%c0_20, %c0_21, %c0_22] : memref<1x8x128xf32, #tpu.memory_space<vmem>>, vector<1x8x128xf32>
    tpu.vector_store %arg7[%c0_20, %c0_21, %c0_22], %37 {strides = array<i32>} : memref<1x8x128xf32, #tpu.memory_space<vmem>>, vector<1x8x128xf32>,
    return
  }
  func.func @transform_0(%arg0: i32) -> (i32, i32) {
    %c0_i32 = arith.constant 0 : i32
    %c0_i32_0 = arith.constant 0 : i32
    return %arg0, %c0_i32 : i32, i32
  }
  func.func @transform_1(%arg0: i32) -> (i32, i32) {
    %c0_i32 = arith.constant 0 : i32
    %c0_i32_0 = arith.constant 0 : i32
    %c0_i32_1 = arith.constant 0 : i32
    return %c0_i32, %c0_i32_0 : i32, i32
  }
  func.func @transform_2(%arg0: i32) -> (i32, i32) {
    %c0_i32 = arith.constant 0 : i32
    %c0_i32_0 = arith.constant 0 : i32
    return %arg0, %c0_i32 : i32, i32
  }
  func.func @transform_3(%arg0: i32) -> (i32, i32) {
    %c0_i32 = arith.constant 0 : i32
    %c0_i32_0 = arith.constant 0 : i32
    %c0_i32_1 = arith.constant 0 : i32
    return %c0_i32, %c0_i32_0 : i32, i32
  }
  func.func @transform_4(%arg0: i32) -> (i32, i32) {
    %c0_i32 = arith.constant 0 : i32
    %c0_i32_0 = arith.constant 0 : i32
    return %arg0, %c0_i32 : i32, i32
  }
  func.func @transform_5(%arg0: i32) -> (i32, i32) {
    %c0_i32 = arith.constant 0 : i32
    %c0_i32_0 = arith.constant 0 : i32
    %c0_i32_1 = arith.constant 0 : i32
    return %c0_i32, %c0_i32_0 : i32, i32
  }
  func.func @transform_6(%arg0: i32) -> (i32, i32, i32) {
    %c0_i32 = arith.constant 0 : i32
    %c0_i32_0 = arith.constant 0 : i32
    %c0_i32_1 = arith.constant 0 : i32
    return %arg0, %c0_i32, %c0_i32_0 : i32, i32, i32
  }
}

module attributes {stable_mosaic.version = 11 : i64} {
  func.func @_triplet_kernel(%arg0: i32, %arg1: memref<8x128xf32, #tpu.memory_space<vmem>>, %arg2: memref<128x8xf32, #tpu.memory_space<vmem>>, %arg3: memref<8x1xf32, #tpu.memory_space<vmem>>, %arg4: memref<1x8xf32, #tpu.memory_space<vmem>>, %arg5: memref<8x1xi32, #tpu.memory_space<vmem>>, %arg6: memref<1x8xi32, #tpu.memory_space<vmem>>, %arg7: memref<1x8x128xf32, #tpu.memory_space<vmem>>) attributes {dimension_semantics = [#tpu.dimension_semantics<parallel>], iteration_bounds = array<i64: 1>, scalar_prefetch = 0 : i64, scratch_operands = 0 : i64, tpu.core_type = #tpu.core_type<tc>, window_params = [{transform_indices = @transform_0, window_bounds = array<i64: 8, 128>}, {pipeline_mode = #tpu.pipeline_mode<synchronous>, transform_indices = @transform_1, window_bounds = array<i64: 128, 8>}, {transform_indices = @transform_2, window_bounds = array<i64: 8, 1>}, {pipeline_mode = #tpu.pipeline_mode<synchronous>, transform_indices = @transform_3, window_bounds = array<i64: 1, 8>}, {transform_indices = @transform_4, window_bounds = array<i64: 8, 1>}, {pipeline_mode = #tpu.pipeline_mode<synchronous>, transform_indices = @transform_5, window_bounds = array<i64: 1, 8>}, {transform_indices = @transform_6, window_bounds = array<i64: 1, 8, 128>}]} {
    %c0 = arith.constant 0 : index
    %c0_0 = arith.constant 0 : index
    %0 = vector.load %arg1[%c0, %c0_0] : memref<8x128xf32, #tpu.memory_space<vmem>>, vector<8x128xf32>
    %c0_1 = arith.constant 0 : index
    %c0_2 = arith.constant 0 : index
    %1 = vector.load %arg2[%c0_1, %c0_2] : memref<128x8xf32, #tpu.memory_space<vmem>>, vector<128x8xf32>
    %cst = arith.constant dense<0.000000e+00> : vector<8x8xf32>
    %2 = tpu.matmul %0, %1, %cst {dimension_numbers = #tpu.dot_dimension_numbers<[1], [0], [0], [1], [0, 0, 1, 1], [], []>} : vector<8x128xf32>, vector<128x8xf32>, vector<8x8xf32> -> vector<8x8xf32>
    %c0_3 = arith.constant 0 : index
    %c0_4 = arith.constant 0 : index
    %3 = vector.load %arg3[%c0_3, %c0_4] : memref<8x1xf32, #tpu.memory_space<vmem>>, vector<8x1xf32>
    %c0_5 = arith.constant 0 : index
    %c0_6 = arith.constant 0 : index
    %4 = vector.load %arg4[%c0_5, %c0_6] : memref<1x8xf32, #tpu.memory_space<vmem>>, vector<1x8xf32>
    %5 = vector.broadcast %3 : vector<8x1xf32> to vector<8x8xf32>
    %6 = vector.broadcast %4 : vector<1x8xf32> to vector<8x8xf32>
    %7 = arith.addf %5, %6 : vector<8x8xf32>
    %cst_7 = arith.constant 2.000000e+00 : f32
    %8 = vector.broadcast %cst_7 : f32 to vector<8x8xf32>
    %9 = arith.mulf %8, %2 : vector<8x8xf32>
    %10 = arith.subf %7, %9 : vector<8x8xf32>
    %cst_8 = arith.constant 9.99999996E-13 : f32
    %11 = vector.broadcast %cst_8 : f32 to vector<8x8xf32>
    %12 = arith.maximumf %10, %11 : vector<8x8xf32>
    %c0_9 = arith.constant 0 : index
    %c0_10 = arith.constant 0 : index
    %13 = vector.load %arg5[%c0_9, %c0_10] : memref<8x1xi32, #tpu.memory_space<vmem>>, vector<8x1xi32>
    %c0_11 = arith.constant 0 : index
    %c0_12 = arith.constant 0 : index
    %14 = vector.load %arg6[%c0_11, %c0_12] : memref<1x8xi32, #tpu.memory_space<vmem>>, vector<1x8xi32>
    %15 = vector.broadcast %13 : vector<8x1xi32> to vector<8x8xi32>
    %16 = vector.broadcast %14 : vector<1x8xi32> to vector<8x8xi32>
    %17 = arith.cmpi eq, %15, %16 : vector<8x8xi32>
    %cst_13 = arith.constant 0.000000e+00 : f32
    %18 = vector.broadcast %cst_13 : f32 to vector<8x8xf32>
    %19 = arith.select %17, %12, %18 : vector<8x8xi1>, vector<8x8xf32>
    %cst_14 = arith.constant dense<0xFF800000> : vector<8xf32>
    %20 = vector.multi_reduction <maximumf>, %19, %cst_14 [1] : vector<8x8xf32> to vector<8xf32>
    %21 = vector.shape_cast %20 : vector<8xf32> to vector<8x1xf32>
    %cst_15 = arith.constant 9.99999984E+17 : f32
    %22 = vector.broadcast %cst_15 : f32 to vector<8x8xf32>
    %23 = arith.select %17, %22, %12 : vector<8x8xi1>, vector<8x8xf32>
    %cst_16 = arith.constant dense<0x7F800000> : vector<8xf32>
    %24 = vector.multi_reduction <minimumf>, %23, %cst_16 [1] : vector<8x8xf32> to vector<8xf32>
    %25 = vector.shape_cast %24 : vector<8xf32> to vector<8x1xf32>
    %26 = math.sqrt %21 : vector<8x1xf32>
    %27 = math.sqrt %25 : vector<8x1xf32>
    %cst_17 = arith.constant 3.000000e-01 : f32
    %28 = vector.broadcast %cst_17 : f32 to vector<8x1xf32>
    %29 = arith.addf %28, %26 : vector<8x1xf32>
    %30 = arith.subf %29, %27 : vector<8x1xf32>
    %cst_18 = arith.constant 0.000000e+00 : f32
    %31 = vector.broadcast %cst_18 : f32 to vector<8x1xf32>
    %32 = arith.maximumf %30, %31 : vector<8x1xf32>
    %33 = vector.shape_cast %32 : vector<8x1xf32> to vector<1x8x1xf32>
    %cst_19 = arith.constant dense<0.000000e+00> : vector<1xf32>
    %34 = vector.multi_reduction <add>, %33, %cst_19 [1, 2] : vector<1x8x1xf32> to vector<1xf32>
    %35 = vector.shape_cast %34 : vector<1xf32> to vector<1x1x1xf32>
    %36 = vector.extract %35[0, 0, 0] : f32 from vector<1x1x1xf32>
    %37 = vector.broadcast %36 : f32 to vector<1x8x128xf32>
    %c0_20 = arith.constant 0 : index
    %c0_21 = arith.constant 0 : index
    %c0_22 = arith.constant 0 : index
    %38 = vector.load %arg7[%c0_20, %c0_21, %c0_22] : memref<1x8x128xf32, #tpu.memory_space<vmem>>, vector<1x8x128xf32>
    tpu.vector_store %arg7[%c0_20, %c0_21, %c0_22], %37 {strides = array<i32>} : memref<1x8x128xf32, #tpu.memory_space<vmem>>, vector<1x8x128xf32>,
    return
  }
  func.func @transform_0(%arg0: i32) -> (i32, i32) {
    %c0_i32 = arith.constant 0 : i32
    %c0_i32_0 = arith.constant 0 : i32
    return %arg0, %c0_i32 : i32, i32
  }
  func.func @transform_1(%arg0: i32) -> (i32, i32) {
    %c0_i32 = arith.constant 0 : i32
    %c0_i32_0 = arith.constant 0 : i32
    %c0_i32_1 = arith.constant 0 : i32
    return %c0_i32, %c0_i32_0 : i32, i32
  }
  func.func @transform_2(%arg0: i32) -> (i32, i32) {
    %c0_i32 = arith.constant 0 : i32
    %c0_i32_0 = arith.constant 0 : i32
    return %arg0, %c0_i32 : i32, i32
  }
  func.func @transform_3(%arg0: i32) -> (i32, i32) {
    %c0_i32 = arith.constant 0 : i32
    %c0_i32_0 = arith.constant 0 : i32
    %c0_i32_1 = arith.constant 0 : i32
    return %c0_i32, %c0_i32_0 : i32, i32
  }
  func.func @transform_4(%arg0: i32) -> (i32, i32) {
    %c0_i32 = arith.constant 0 : i32
    %c0_i32_0 = arith.constant 0 : i32
    return %arg0, %c0_i32 : i32, i32
  }
  func.func @transform_5(%arg0: i32) -> (i32, i32) {
    %c0_i32 = arith.constant 0 : i32
    %c0_i32_0 = arith.constant 0 : i32
    %c0_i32_1 = arith.constant 0 : i32
    return %c0_i32, %c0_i32_0 : i32, i32
  }
  func.func @transform_6(%arg0: i32) -> (i32, i32, i32) {
    %c0_i32 = arith.constant 0 : i32
    %c0_i32_0 = arith.constant 0 : i32
    %c0_i32_1 = arith.constant 0 : i32
    return %arg0, %c0_i32, %c0_i32_0 : i32, i32, i32
  }
}

</mosaic_0001>

<bundles_post_ra>
// kernel: tpu_custom_call.1
= control target key start
LH: loop header
LB: loop body
LE: loop exit
PB: predicated region body
PF: predicated region fallthrough
CT: control target
= control target key end

     0   :  { %v305_v3 = vmov 0.0|0.0   ;;  %vm306_vm0 = vmmov 0   ;;  %v307_v6 = vmov 0.0   ;;  %v308_v7 = vmov 0   ;;  %s420_s0 = inlined_call_operand.vmem [shape: f32[8,128], index: 0, kind: input, shape index: {}]   ;;  %s421_s1 = inlined_call_operand.vmem [shape: f32[128,8], index: 1, kind: input, shape index: {}]   ;;  %s422_s2 = inlined_call_operand.vmem [shape: f32[8,1], index: 2, kind: input, shape index: {}]   ;;  %s423_s3 = inlined_call_operand.vmem [shape: f32[1,8], index: 3, kind: input, shape index: {}]   ;;  %s424_s4 = inlined_call_operand.vmem [shape: s32[8,1], index: 4, kind: input, shape index: {}]   ;;  %s425_s5 = inlined_call_operand.vmem [shape: s32[1,8], index: 5, kind: input, shape index: {}]   ;;  %s426_s6 = inlined_call_operand.hbm [shape: f32[1,8,128], index: 6, kind: output, shape index: {}]  }
   0x1   :  { %v25_v0 = vld [vmem:[%s421_s1] sm:$0xff]  ;;  %v26_v1 = vld [vmem:[%s421_s1 + $0x8] sm:$0xff]  ;;  %v27_v2 = vld [vmem:[%s421_s1 + $0x10] sm:$0xff]  ;;  %245 = vmatprep.subr.bf16.mxu0 %v305_v3  ;;  %242 = vmatprep.mubr.msk.f32.mxu0 %vm306_vm0, %v307_v6 }
   0x2   :  { %v246_v4 = vpack.c.bf16 %v26_v1, %v25_v0  ;;  %v28_v5 = vld [vmem:[%s421_s1 + $0x18] sm:$0xff]  ;;  %276 = vset.pattern.permute.xlu0 %v308_v7  ;;  %v29_v9 = vld [vmem:[%s421_s1 + $0x20] sm:$0xff]  ;;  %v30_v10 = vld [vmem:[%s421_s1 + $0x28] sm:$0xff] }
   0x3   :  { %v249_v8 = vpack.c.bf16 %v28_v5, %v27_v2  ;;  %v111_v11 = vld [vmem:[%s422_s2] sm:$0xff]  ;;  %v252_v12 = vpack.c.bf16 %v30_v10, %v29_v9 }
   0x4   :  { %247 = vmatpush3.bf16.msra.mxu0 %v246_v4  ;;  %115 = vperm.xlu0 %276, %v111_v11   ;;  %v128_v13 = vld [vmem:[%s424_s4] sm:$0xff] }
   0x5   :  { %248 = vmatprep.subr.bf16.mxu0 %v305_v3 }
   0x8   :  { %250 = vmatpush3.bf16.msra.mxu0 %v249_v8 }
   0x9   :  { %11 = vsyncpa [#allocation3], 0  ;;  %251 = vmatprep.subr.bf16.mxu0 %v305_v3  ;;  %v31_v14 = vld [vmem:[%s421_s1 + $0x30] sm:$0xff]  ;;  %v32_v15 = vld [vmem:[%s421_s1 + $0x38] sm:$0xff]  ;;  %131 = vperm.xlu0 %276, %v128_v13   ;;  %vm139_vm1 = vcmask 64512   ;;  %vm164_vm7 = vcmask 7168  }
   0xa   :  { %v255_v16 = vpack.c.bf16 %v32_v15, %v31_v14  ;;  %v33_v17 = vld [vmem:[%s421_s1 + $0x40] sm:$0xff]  ;;  %v34_v18 = vld [vmem:[%s421_s1 + $0x48] sm:$0xff]  ;;  %v35_v20 = vld [vmem:[%s421_s1 + $0x50] sm:$0xff] }
   0xb   :  { %v258_v19 = vpack.c.bf16 %v34_v18, %v33_v17  ;;  %v36_v21 = vld [vmem:[%s421_s1 + $0x58] sm:$0xff]  ;;  %v37_v23 = vld [vmem:[%s421_s1 + $0x60] sm:$0xff]  ;;  %v38_v24 = vld [vmem:[%s421_s1 + $0x68] sm:$0xff] }
   0xc   :  { %253 = vmatpush3.bf16.msra.mxu0 %v252_v12  ;;  %v261_v22 = vpack.c.bf16 %v36_v21, %v35_v20  ;;  %v264_v25 = vpack.c.bf16 %v38_v24, %v37_v23  ;;  %v39_v26 = vld [vmem:[%s421_s1 + $0x70] sm:$0xff]  ;;  %v40_v27 = vld [vmem:[%s421_s1 + $0x78] sm:$0xff]  ;;  %v24_v29 = vld [vmem:[%s420_s0] sm:$0xff]  ;;  %s309_s0 = smov [#allocation2]  }
   0xd   :  { %254 = vmatprep.subr.bf16.mxu0 %v305_v3  ;;  %v267_v28 = vpack.c.bf16 %v40_v27, %v39_v26  ;;  %v191_v30 = vld [vmem:[%s423_s3] ss:$0 sm:$0xff]  ;;  %s183_s3 = sshll.u32 %s309_s0, 4  ;;  %s184_s3 = int_to_ptr.vmem [resolvable:$true] %s183_s3 }
   0xe   :  { %v192_v36 = vld [vmem:[%s425_s5] ss:$0 sm:$0xff]  ;;  %s281_s12 = scalar_lea.vmem %s184_s3, 128  ;;  %p286_p1 = scmp.lt.s32.totalorder %s184_s3, %s184_s3 }
   0xf   :  { %p282_p0 = scmp.ne.s32.totalorder %s184_s3, %s281_s12  ;;  %p287_p2 = scmp.lt.s32.totalorder %s281_s12, %s281_s12 }
  0x10   :  { %256 = vmatpush3.bf16.msra.mxu0 %v255_v16 }
  0x11   :  { %257 = vmatprep.subr.bf16.mxu0 %v305_v3  ;;  %p288_p3 = por %p287_p2, %p286_p1 }
  0x13   :  { %p289_p4 = pnand %p288_p3, %p282_p0 }
  0x14   :  { %259 = vmatpush3.bf16.msra.mxu0 %v258_v19 }
  0x15   :  { %260 = vmatprep.subr.bf16.mxu0 %v305_v3 }
  0x18   :  { %262 = vmatpush3.bf16.msra.mxu0 %v261_v22 }
  0x19   :  { %263 = vmatprep.subr.bf16.mxu0 %v305_v3 }
  0x1c   :  { %265 = vmatpush3.bf16.msra.mxu0 %v264_v25 }
  0x1d   :  { %266 = vmatprep.subr.bf16.mxu0 %v305_v3 }
  0x20   :  { %268 = vmatpush3.bf16.msra.mxu0 %v267_v28 }
  0x23   :  { %243 = vmatmul.mubr.f32.vlgmr.msra.gmra.mrb[0].mxu0 %v24_v29 }
  0x83   :  { %v116_v31 = vpop.permute.xlu0 %115 }
  0x84   :  { %v124_v32 = vadd.f32 %v191_v30, %v116_v31 }
  0x88   :  { %v132_v37 = vpop.permute.xlu0 %131 }
  0x89   :  { %vm137_vm2 = vcmp.eq.s32.totalorder %v132_v37, %v192_v36 }
  0xf6   :  { %v107_v33 = vpop.f32.mrb[0].mxu0 }
  0xf7   :  { %v125_v34 = vmul.f32 2.0, %v107_v33  ;;  %v244_v35 = vpop.f32.mrb[1].mxu0 }
  0xf9   :  { %v126_v38 = vsub.f32 %v124_v32, %v125_v34 }
  0xfb   :  { %v127_v39 = vmax.f32 %v126_v38, 1e-12 }
  0xfd   :  { %v138_v40 = vsel %vm137_vm2, %v127_v39, 0.0  ;;  %v143_v42 = vsel %vm137_vm2, 1e+18, %v127_v39 }
  0xfe   :  { %v140_v41 = vsel %vm139_vm1, %v138_v40, -inf  ;;  %v144_v43 = vsel %vm139_vm1, %v143_v42, inf }
  0xff   :  { %141 = vmax.xlane.f32.xlu1 %v140_v41 }
 0x103   :  { %145 = vmin.xlane.f32.xlu1 %v144_v43 }
 0x18c   :  { %v142_v44 = vpop.xlane.xlu1 %141 }
 0x18d   :  { %277 = vrsqrt.f32 %v142_v44  ;;  %vm149_vm3 = vcmp.eq.f32.partialorder %v142_v44, inf  ;;  %v152_v48 = vand.u32 2147483648, %v142_v44  ;;  %vm151_vm4 = vcmp.eq.f32.partialorder %v142_v44, 0.0 }
 0x190   :  { %v146_v45 = vpop.xlane.xlu1 %145 }
 0x191   :  { %279 = vrsqrt.f32 %v146_v45  ;;  %vm156_vm5 = vcmp.eq.f32.partialorder %v146_v45, inf  ;;  %v159_v53 = vand.u32 2147483648, %v146_v45  ;;  %vm158_vm6 = vcmp.eq.f32.partialorder %v146_v45, 0.0 }
 0x197   :  { %v278_v46 = vpop.eup %277 }
 0x198   :  { %v148_v47 = vmul.f32 %v278_v46, %v142_v44 }
 0x19a   :  { %v150_v49 = vsel %vm149_vm3, %v142_v44, %v148_v47 }
 0x19b   :  { %v280_v50 = vpop.eup %279  ;;  %v153_v51 = vsel %vm151_vm4, %v152_v48, %v150_v49 }
 0x19c   :  { %v155_v52 = vmul.f32 %v280_v50, %v146_v45  ;;  %v161_v55 = vadd.f32 0.3, %v153_v51 }
 0x19e   :  { %v157_v54 = vsel %vm156_vm5, %v146_v45, %v155_v52 }
 0x19f   :  { %v160_v56 = vsel %vm158_vm6, %v159_v53, %v157_v54 }
 0x1a0   :  { %v162_v57 = vsub.f32 %v161_v55, %v160_v56 }
 0x1a2   :  { %v163_v58 = vmax.f32 %v162_v57, 0.0 }
 0x1a4   :  { %v165_v59 = vsel %vm164_vm7, %v163_v58, 0.0 }
 0x1a5   :  { %166 = vadd.xlane.f32.xlu0 %v165_v59 }
 0x232   :  { %v167_v60 = vpop.xlane.xlu0 %166 }
 0x233   :  { %v168_v61 = vrot.slane %v167_v60, 4 }
 0x235   :  { %v169_v62 = vadd.f32 %v168_v61, %v167_v60 }
 0x237   :  { %v170_v63 = vrot.slane %v169_v62, 2 }
 0x239   :  { %v171_v0 = vadd.f32 %v170_v63, %v169_v62 }
 0x23b   :  { %v172_v1 = vrot.slane %v171_v0, 1 }
 0x23d   :  { %v173_v2 = vadd.f32 %v172_v1, %v171_v0 }
 0x23f   :  { %269 = vpush %v173_v2 }
 0x270   :  { %s270_s5 = spop %269 }
 0x271   :  { %v175_v3 = vstv %s270_s5 }
 0x272   :  { %176 = vst [vmem:[#allocation2] sm:$0xff] %v175_v3 }
 0x273   :  { %292 = shalt.err (!%p289_p4)
}
 0x274   :  { %s293_s15 = scalar_lea.hbm %s426_s6, 128 }
 0x275   :  { %p294_p5 = scmp.ne.s32.totalorder %s426_s6, %s293_s15  ;;  %p297_p6 = scmp.lt.u32.totalorder %s293_s15, %s426_s6 }
 0x277   :  { %p299_p7 = pnand %p297_p6, %p294_p5 }
 0x279   :  { %302 = shalt.err (!%p299_p7)
}
 0x27a   :  { %186 = dma.vmem_to_hbm [thread:$0]  %s184_s3, 128, %s426_s6, [#allocation3]  }
 0x27b   :  { %303 = dma.done.wait [#allocation3], 128  }
 0x27c   :  { %304 = vsyncadd [#allocation3], 4294967168 }
 0x27d   :  { %190 = vsyncpa [#allocation3], 1 }

// kernel: tpu_custom_call.1
= control target key start
LH: loop header
LB: loop body
LE: loop exit
PB: predicated region body
PF: predicated region fallthrough
CT: control target
= control target key end

     0   :  { %v305_v3 = vmov 0.0|0.0   ;;  %vm306_vm0 = vmmov 0   ;;  %v307_v6 = vmov 0.0   ;;  %v308_v7 = vmov 0   ;;  %s420_s0 = inlined_call_operand.vmem [shape: f32[8,128], index: 0, kind: input, shape index: {}]   ;;  %s421_s1 = inlined_call_operand.vmem [shape: f32[128,8], index: 1, kind: input, shape index: {}]   ;;  %s422_s2 = inlined_call_operand.vmem [shape: f32[8,1], index: 2, kind: input, shape index: {}]   ;;  %s423_s3 = inlined_call_operand.vmem [shape: f32[1,8], index: 3, kind: input, shape index: {}]   ;;  %s424_s4 = inlined_call_operand.vmem [shape: s32[8,1], index: 4, kind: input, shape index: {}]   ;;  %s425_s5 = inlined_call_operand.vmem [shape: s32[1,8], index: 5, kind: input, shape index: {}]   ;;  %s426_s6 = inlined_call_operand.hbm [shape: f32[1,8,128], index: 6, kind: output, shape index: {}]  }
   0x1   :  { %v25_v0 = vld [vmem:[%s421_s1] sm:$0xff]  ;;  %v26_v1 = vld [vmem:[%s421_s1 + $0x8] sm:$0xff]  ;;  %v27_v2 = vld [vmem:[%s421_s1 + $0x10] sm:$0xff]  ;;  %245 = vmatprep.subr.bf16.mxu0 %v305_v3  ;;  %242 = vmatprep.mubr.msk.f32.mxu0 %vm306_vm0, %v307_v6 }
   0x2   :  { %v246_v4 = vpack.c.bf16 %v26_v1, %v25_v0  ;;  %v28_v5 = vld [vmem:[%s421_s1 + $0x18] sm:$0xff]  ;;  %276 = vset.pattern.permute.xlu0 %v308_v7  ;;  %v29_v9 = vld [vmem:[%s421_s1 + $0x20] sm:$0xff]  ;;  %v30_v10 = vld [vmem:[%s421_s1 + $0x28] sm:$0xff] }
   0x3   :  { %v249_v8 = vpack.c.bf16 %v28_v5, %v27_v2  ;;  %v111_v11 = vld [vmem:[%s422_s2] sm:$0xff]  ;;  %v252_v12 = vpack.c.bf16 %v30_v10, %v29_v9 }
   0x4   :  { %247 = vmatpush3.bf16.msra.mxu0 %v246_v4  ;;  %115 = vperm.xlu0 %276, %v111_v11   ;;  %v128_v13 = vld [vmem:[%s424_s4] sm:$0xff] }
   0x5   :  { %248 = vmatprep.subr.bf16.mxu0 %v305_v3 }
   0x8   :  { %250 = vmatpush3.bf16.msra.mxu0 %v249_v8 }
   0x9   :  { %11 = vsyncpa [#allocation3], 0  ;;  %251 = vmatprep.subr.bf16.mxu0 %v305_v3  ;;  %v31_v14 = vld [vmem:[%s421_s1 + $0x30] sm:$0xff]  ;;  %v32_v15 = vld [vmem:[%s421_s1 + $0x38] sm:$0xff]  ;;  %131 = vperm.xlu0 %276, %v128_v13   ;;  %vm139_vm1 = vcmask 64512   ;;  %vm164_vm7 = vcmask 7168  }
   0xa   :  { %v255_v16 = vpack.c.bf16 %v32_v15, %v31_v14  ;;  %v33_v17 = vld [vmem:[%s421_s1 + $0x40] sm:$0xff]  ;;  %v34_v18 = vld [vmem:[%s421_s1 + $0x48] sm:$0xff]  ;;  %v35_v20 = vld [vmem:[%s421_s1 + $0x50] sm:$0xff] }
   0xb   :  { %v258_v19 = vpack.c.bf16 %v34_v18, %v33_v17  ;;  %v36_v21 = vld [vmem:[%s421_s1 + $0x58] sm:$0xff]  ;;  %v37_v23 = vld [vmem:[%s421_s1 + $0x60] sm:$0xff]  ;;  %v38_v24 = vld [vmem:[%s421_s1 + $0x68] sm:$0xff] }
   0xc   :  { %253 = vmatpush3.bf16.msra.mxu0 %v252_v12  ;;  %v261_v22 = vpack.c.bf16 %v36_v21, %v35_v20  ;;  %v264_v25 = vpack.c.bf16 %v38_v24, %v37_v23  ;;  %v39_v26 = vld [vmem:[%s421_s1 + $0x70] sm:$0xff]  ;;  %v40_v27 = vld [vmem:[%s421_s1 + $0x78] sm:$0xff]  ;;  %v24_v29 = vld [vmem:[%s420_s0] sm:$0xff]  ;;  %s309_s0 = smov [#allocation2]  }
   0xd   :  { %254 = vmatprep.subr.bf16.mxu0 %v305_v3  ;;  %v267_v28 = vpack.c.bf16 %v40_v27, %v39_v26  ;;  %v191_v30 = vld [vmem:[%s423_s3] ss:$0 sm:$0xff]  ;;  %s183_s3 = sshll.u32 %s309_s0, 4  ;;  %s184_s3 = int_to_ptr.vmem [resolvable:$true] %s183_s3 }
   0xe   :  { %v192_v36 = vld [vmem:[%s425_s5] ss:$0 sm:$0xff]  ;;  %s281_s12 = scalar_lea.vmem %s184_s3, 128  ;;  %p286_p1 = scmp.lt.s32.totalorder %s184_s3, %s184_s3 }
   0xf   :  { %p282_p0 = scmp.ne.s32.totalorder %s184_s3, %s281_s12  ;;  %p287_p2 = scmp.lt.s32.totalorder %s281_s12, %s281_s12 }
  0x10   :  { %256 = vmatpush3.bf16.msra.mxu0 %v255_v16 }
  0x11   :  { %257 = vmatprep.subr.bf16.mxu0 %v305_v3  ;;  %p288_p3 = por %p287_p2, %p286_p1 }
  0x13   :  { %p289_p4 = pnand %p288_p3, %p282_p0 }
  0x14   :  { %259 = vmatpush3.bf16.msra.mxu0 %v258_v19 }
  0x15   :  { %260 = vmatprep.subr.bf16.mxu0 %v305_v3 }
  0x18   :  { %262 = vmatpush3.bf16.msra.mxu0 %v261_v22 }
  0x19   :  { %263 = vmatprep.subr.bf16.mxu0 %v305_v3 }
  0x1c   :  { %265 = vmatpush3.bf16.msra.mxu0 %v264_v25 }
  0x1d   :  { %266 = vmatprep.subr.bf16.mxu0 %v305_v3 }
  0x20   :  { %268 = vmatpush3.bf16.msra.mxu0 %v267_v28 }
  0x23   :  { %243 = vmatmul.mubr.f32.vlgmr.msra.gmra.mrb[0].mxu0 %v24_v29 }
  0x83   :  { %v116_v31 = vpop.permute.xlu0 %115 }
  0x84   :  { %v124_v32 = vadd.f32 %v191_v30, %v116_v31 }
  0x88   :  { %v132_v37 = vpop.permute.xlu0 %131 }
  0x89   :  { %vm137_vm2 = vcmp.eq.s32.totalorder %v132_v37, %v192_v36 }
  0xf6   :  { %v107_v33 = vpop.f32.mrb[0].mxu0 }
  0xf7   :  { %v125_v34 = vmul.f32 2.0, %v107_v33  ;;  %v244_v35 = vpop.f32.mrb[1].mxu0 }
  0xf9   :  { %v126_v38 = vsub.f32 %v124_v32, %v125_v34 }
  0xfb   :  { %v127_v39 = vmax.f32 %v126_v38, 1e-12 }
  0xfd   :  { %v138_v40 = vsel %vm137_vm2, %v127_v39, 0.0  ;;  %v143_v42 = vsel %vm137_vm2, 1e+18, %v127_v39 }
  0xfe   :  { %v140_v41 = vsel %vm139_vm1, %v138_v40, -inf  ;;  %v144_v43 = vsel %vm139_vm1, %v143_v42, inf }
  0xff   :  { %141 = vmax.xlane.f32.xlu1 %v140_v41 }
 0x103   :  { %145 = vmin.xlane.f32.xlu1 %v144_v43 }
 0x18c   :  { %v142_v44 = vpop.xlane.xlu1 %141 }
 0x18d   :  { %277 = vrsqrt.f32 %v142_v44  ;;  %vm149_vm3 = vcmp.eq.f32.partialorder %v142_v44, inf  ;;  %v152_v48 = vand.u32 2147483648, %v142_v44  ;;  %vm151_vm4 = vcmp.eq.f32.partialorder %v142_v44, 0.0 }
 0x190   :  { %v146_v45 = vpop.xlane.xlu1 %145 }
 0x191   :  { %279 = vrsqrt.f32 %v146_v45  ;;  %vm156_vm5 = vcmp.eq.f32.partialorder %v146_v45, inf  ;;  %v159_v53 = vand.u32 2147483648, %v146_v45  ;;  %vm158_vm6 = vcmp.eq.f32.partialorder %v146_v45, 0.0 }
 0x197   :  { %v278_v46 = vpop.eup %277 }
 0x198   :  { %v148_v47 = vmul.f32 %v278_v46, %v142_v44 }
 0x19a   :  { %v150_v49 = vsel %vm149_vm3, %v142_v44, %v148_v47 }
 0x19b   :  { %v280_v50 = vpop.eup %279  ;;  %v153_v51 = vsel %vm151_vm4, %v152_v48, %v150_v49 }
 0x19c   :  { %v155_v52 = vmul.f32 %v280_v50, %v146_v45  ;;  %v161_v55 = vadd.f32 0.3, %v153_v51 }
 0x19e   :  { %v157_v54 = vsel %vm156_vm5, %v146_v45, %v155_v52 }
 0x19f   :  { %v160_v56 = vsel %vm158_vm6, %v159_v53, %v157_v54 }
 0x1a0   :  { %v162_v57 = vsub.f32 %v161_v55, %v160_v56 }
 0x1a2   :  { %v163_v58 = vmax.f32 %v162_v57, 0.0 }
 0x1a4   :  { %v165_v59 = vsel %vm164_vm7, %v163_v58, 0.0 }
 0x1a5   :  { %166 = vadd.xlane.f32.xlu0 %v165_v59 }
 0x232   :  { %v167_v60 = vpop.xlane.xlu0 %166 }
 0x233   :  { %v168_v61 = vrot.slane %v167_v60, 4 }
 0x235   :  { %v169_v62 = vadd.f32 %v168_v61, %v167_v60 }
 0x237   :  { %v170_v63 = vrot.slane %v169_v62, 2 }
 0x239   :  { %v171_v0 = vadd.f32 %v170_v63, %v169_v62 }
 0x23b   :  { %v172_v1 = vrot.slane %v171_v0, 1 }
 0x23d   :  { %v173_v2 = vadd.f32 %v172_v1, %v171_v0 }
 0x23f   :  { %269 = vpush %v173_v2 }
 0x270   :  { %s270_s5 = spop %269 }
 0x271   :  { %v175_v3 = vstv %s270_s5 }
 0x272   :  { %176 = vst [vmem:[#allocation2] sm:$0xff] %v175_v3 }
 0x273   :  { %292 = shalt.err (!%p289_p4)
}
 0x274   :  { %s293_s15 = scalar_lea.hbm %s426_s6, 128 }
 0x275   :  { %p294_p5 = scmp.ne.s32.totalorder %s426_s6, %s293_s15  ;;  %p297_p6 = scmp.lt.u32.totalorder %s293_s15, %s426_s6 }
 0x277   :  { %p299_p7 = pnand %p297_p6, %p294_p5 }
 0x279   :  { %302 = shalt.err (!%p299_p7)
}
 0x27a   :  { %186 = dma.vmem_to_hbm [thread:$0]  %s184_s3, 128, %s426_s6, [#allocation3]  }
 0x27b   :  { %303 = dma.done.wait [#allocation3], 128  }
 0x27c   :  { %304 = vsyncadd [#allocation3], 4294967168 }
 0x27d   :  { %190 = vsyncpa [#allocation3], 1 }

</bundles_post_ra>
